<compile_context>
chip_gen: v6e
topology: v6e:2x2x1
jax: 0.10.0
libtpu: 0.0.40
codegen_flags: <defaults>
</compile_context>

<pallas_src>
import numpy as np
import jax
import jax.numpy as jnp
from jax import lax
from jax.experimental import pallas as pl
from jax.experimental.pallas import tpu as pltpu

INV_SQRT2 = 0.7071067811865476
LN_EPS = 1e-5       # nn.LayerNorm default eps
NORM_EPS = 1e-12    # F.normalize default eps

# ----------------------------- model configuration ----------------------------

B = 2          # batch
P = 32         # CFG.projection_dim
C_CTX = 16     # CFG.context_input_dim
H_WAV = 48     # wav2vec2 hidden_size (stand-in)
T = 8          # number of audio frames ("sequence length" of wav2vec2 output)
FRAME = 24     # samples per frame
L = T * FRAME  # raw audio length
IMG_SHAPE = (B, 3, 16, 16)
IMG_FLAT = 3 * 16 * 16

# packed bias/gamma/beta slab layout: one lane-dense (N_VEC, 128) f32 array
SLAB_W = 128
(ROW_IMG_B, ROW_WAV_B, ROW_PH_B1, ROW_PH_B2, ROW_PH_G, ROW_PH_BE,
 ROW_C_B1, ROW_C_B2, ROW_C_B3, ROW_C_G, ROW_C_BE) = range(11)
N_VEC = 11


# ----------------------------- in-kernel helpers ------------------------------


def _gelu(x):
    # nn.GELU() default = exact erf formulation
    return 0.5 * x * (1.0 + lax.erf(x * INV_SQRT2))


def _layernorm(x, gamma, beta):
    mu = jnp.mean(x, axis=-1, keepdims=True)
    var = jnp.mean(jnp.square(x - mu), axis=-1, keepdims=True)
    return (x - mu) * lax.rsqrt(var + LN_EPS) * gamma + beta


def _l2norm(x):
    # F.normalize(p=2, dim=-1, eps=1e-12)
    return x / jnp.maximum(
        jnp.sqrt(jnp.sum(x * x, axis=-1, keepdims=True)), NORM_EPS)


# --------------------------------- fused kernel --------------------------------


def fused_forward_kernel(img_ref, frames_ref, ctx_ref,
                         img_w_ref, wav_w_ref, ph_w1_ref, ph_w2_ref,
                         c_w1_ref, c_w2_ref, c_w3_ref,
                         vec_ref, t_ref, loss_ref):
    # Unpack the lane-dense parameter-vector slab (one DMA, static slices).
    V = vec_ref[...]                                     # (N_VEC, 128)
    img_b = V[ROW_IMG_B:ROW_IMG_B + 1, :P]
    wav_b = V[ROW_WAV_B:ROW_WAV_B + 1, :H_WAV]
    ph_b1 = V[ROW_PH_B1:ROW_PH_B1 + 1, :P]
    ph_b2 = V[ROW_PH_B2:ROW_PH_B2 + 1, :P]
    ph_g = V[ROW_PH_G:ROW_PH_G + 1, :P]
    ph_be = V[ROW_PH_BE:ROW_PH_BE + 1, :P]
    c_b1 = V[ROW_C_B1:ROW_C_B1 + 1, :64]
    c_b2 = V[ROW_C_B2:ROW_C_B2 + 1, :128]
    c_b3 = V[ROW_C_B3:ROW_C_B3 + 1, :P]
    c_g = V[ROW_C_G:ROW_C_G + 1, :P]
    c_be = V[ROW_C_BE:ROW_C_BE + 1, :P]

    # ---- image branch ----------------------------------------------------------
    # TODO(synk): stand-in for pretrained OneEncoderUP.encode_image (single linear).
    image_features = jnp.dot(img_ref[...], img_w_ref[...],
                             preferred_element_type=jnp.float32) + img_b      # (B, P)

    # ---- audio branch ----------------------------------------------------------
    # TODO(synk): stand-in for frozen Wav2Vec2Model (per-frame linear feature extractor).
    hidden = jnp.dot(frames_ref[...], wav_w_ref[...],
                     preferred_element_type=jnp.float32) + wav_b              # (B*T, H_WAV)
    # ProjectionHead: Linear -> GELU -> Linear -> Dropout(identity, eval) -> LayerNorm
    h = _gelu(jnp.dot(hidden, ph_w1_ref[...],
                      preferred_element_type=jnp.float32) + ph_b1)
    y = jnp.dot(h, ph_w2_ref[...], preferred_element_type=jnp.float32) + ph_b2
    wav_tok = _layernorm(y, ph_g, ph_be)                                      # (B*T, P)

    # ---- context branch --------------------------------------------------------
    # ContextEncoder.model: Linear->ReLU->Linear->ReLU->Linear->LayerNorm on (1, C_CTX)
    c = jnp.dot(ctx_ref[...], c_w1_ref[...],
                preferred_element_type=jnp.float32) + c_b1
    c = jnp.maximum(c, 0.0)
    c = jnp.dot(c, c_w2_ref[...], preferred_element_type=jnp.float32) + c_b2
    c = jnp.maximum(c, 0.0)
    c = jnp.dot(c, c_w3_ref[...], preferred_element_type=jnp.float32) + c_b3
    ctx_feat = _layernorm(c, c_g, c_be)                                       # (1, P)

    # ---- fusion ----------------------------------------------------------------
    # TODO(synk): OneEncoderUP.fusion_encoder(...).average_outputs is an external
    # pretrained module; stand-in = per-sample mean over T wav tokens averaged with
    # the (broadcast) context features.  The T-mean is done on the flat (B*T, P)
    # VMEM tile with a tiny MXU averaging matrix (no reshape / strided reduce).
    rows = lax.broadcasted_iota(jnp.int32, (B, B * T), 0)
    cols = lax.broadcasted_iota(jnp.int32, (B, B * T), 1)
    lo = rows * T
    avg_mat = jnp.where(jnp.logical_and(cols >= lo, cols < lo + T),
                        jnp.float32(1.0 / T), jnp.float32(0.0))               # (B, B*T)
    wav_mean = jnp.dot(avg_mat, wav_tok,
                       preferred_element_type=jnp.float32)                    # (B, P)
    wav_features = 0.5 * (wav_mean + ctx_feat)                                # (B, P)

    # ---- temperature clamp, L2 normalize, logits, symmetric cross-entropy -------
    t_clip = jnp.clip(t_ref[0, 0], 2.5, 3.0)                 # scalar from SMEM
    scale = jnp.exp(jnp.full((1, 1), t_clip, jnp.float32))   # exp on a (1,1) vreg splat

    img_n = _l2norm(image_features)
    wav_n = _l2norm(wav_features)
    # img_n @ wav_n.T without materializing a transpose: contract last dims.
    logits = lax.dot_general(img_n, wav_n, (((1,), (1,)), ((), ())),
                             preferred_element_type=jnp.float32) * scale      # (B, B)

    # Single shared shifted-exp pass for both row and column log-sum-exp.
    gmax = jnp.max(jnp.max(logits, axis=-1, keepdims=True),
                   axis=0, keepdims=True)                                     # (1, 1)
    e = jnp.exp(logits - gmax)
    lse_r = jnp.log(jnp.sum(e, axis=-1, keepdims=True)) + gmax                # (B, 1)
    lse_c = jnp.log(jnp.sum(e, axis=0, keepdims=True)) + gmax                 # (1, B)

    # Diagonal (labels = arange(B)) extracted once, reused for both loss terms.
    rr = lax.broadcasted_iota(jnp.int32, (B, B), 0)
    cc = lax.broadcasted_iota(jnp.int32, (B, B), 1)
    diag = jnp.sum(jnp.where(rr == cc, logits, 0.0),
                   axis=-1, keepdims=True)                                    # (B, 1)

    sum_lse_r = jnp.sum(lse_r, axis=0, keepdims=True)                         # (1, 1)
    sum_lse_c = jnp.sum(lse_c, axis=1, keepdims=True)                         # (1, 1)
    sum_diag = jnp.sum(diag, axis=0, keepdims=True)                           # (1, 1)

    # 0.5 * (CE(rows) + CE(cols)) with the shared diagonal term.
    loss_ref[...] = (sum_lse_r + sum_lse_c - 2.0 * sum_diag) / (2.0 * B)


# ------------------------------ parameters & glue ------------------------------


def init_params(key):
    ks = jax.random.split(key, 16)
    n = lambda k, s, sc=0.05: (sc * jax.random.normal(k, s)).astype(jnp.float32)

    # TODO(synk): stand-in for pretrained_frugcrl.encode_image (OneEncoderUP image encoder)
    img_w = n(ks[0], (IMG_FLAT, P))
    img_b = n(ks[1], (P,))
    # TODO(synk): stand-in for the frozen Wav2Vec2Model feature extractor + encoder
    wav_feat_w = n(ks[2], (FRAME, H_WAV))
    wav_feat_b = n(ks[3], (H_WAV,))
    # WavEncoder.projection_head (ProjectionHead(hidden_size -> P))
    ph_w1 = n(ks[4], (H_WAV, P))
    ph_b1 = n(ks[5], (P,))
    ph_w2 = n(ks[6], (P, P))
    ph_b2 = n(ks[7], (P,))
    ph_g = jnp.ones((P,), jnp.float32)
    ph_be = jnp.zeros((P,), jnp.float32)
    # ContextEncoder
    ctx_in = (0.3 * jax.random.normal(ks[8], (1, C_CTX))).astype(jnp.float32)
    c_w1 = n(ks[9], (C_CTX, 64))
    c_b1 = n(ks[10], (64,))
    c_w2 = n(ks[11], (64, 128))
    c_b2 = n(ks[12], (128,))
    c_w3 = n(ks[13], (128, P))
    c_b3 = n(ks[14], (P,))
    c_g = jnp.ones((P,), jnp.float32)
    c_be = jnp.zeros((P,), jnp.float32)

    # Pack all small vectors into one lane-dense (N_VEC, 128) slab.
    vecs = [img_b, wav_feat_b, ph_b1, ph_b2, ph_g, ph_be,
            c_b1, c_b2, c_b3, c_g, c_be]
    slab = jnp.stack([jnp.pad(v, (0, SLAB_W - v.shape[0])) for v in vecs])
    assert slab.shape == (N_VEC, SLAB_W)

    return {
        "img_w": img_w,
        "wav_feat_w": wav_feat_w,
        "ph_w1": ph_w1,
        "ph_w2": ph_w2,
        "ctx_in": ctx_in,
        "c_w1": c_w1,
        "c_w2": c_w2,
        "c_w3": c_w3,
        "vec_slab": slab,
        # temperature parameter (0.07 as in the module; clamped to [2.5, 3.0] in forward)
        "temperature": jnp.full((1, 1), 0.07, jnp.float32),
    }


def one_encoder_al_forward(params, images, audios):
    """Mirrors OneEncoderAL.forward(inputs) -> scalar contrastive loss (eval mode)."""
    b = images.shape[0]
    img_flat = images.reshape(b, -1)             # free row-major reshape (NCHW -> flat)
    frames = audios.reshape(b * T, FRAME)        # free row-major reshape

    vmem = pl.BlockSpec(memory_space=pltpu.MemorySpace.VMEM)
    smem = pl.BlockSpec(memory_space=pltpu.MemorySpace.SMEM)

    loss = pl.pallas_call(
        fused_forward_kernel,
        in_specs=[vmem] * 11 + [smem],           # temperature scalar -> SMEM
        out_specs=vmem,
        out_shape=jax.ShapeDtypeStruct((1, 1), jnp.float32),
        compiler_params=pltpu.CompilerParams(vmem_limit_bytes=32 * 1024 * 1024),
    )(img_flat, frames, params["ctx_in"],
      params["img_w"], params["wav_feat_w"], params["ph_w1"], params["ph_w2"],
      params["c_w1"], params["c_w2"], params["c_w3"],
      params["vec_slab"], params["temperature"])
    return loss[0, 0]


if __name__ == "__main__":
    key = jax.random.PRNGKey(0)
    k_p, k_img, k_aud = jax.random.split(key, 3)

    params = init_params(k_p)
    images = jax.random.normal(k_img, IMG_SHAPE, dtype=jnp.float32)   # NCHW (B,3,16,16)
    audios = jax.random.normal(k_aud, (B, L), dtype=jnp.float32)      # raw audio (B, 192)

    loss = one_encoder_al_forward(params, images, audios)
    loss = jax.block_until_ready(loss)
    assert np.isfinite(float(loss))
    print("KERNEL_OK")
</pallas_src>

<mosaic_0001>
module attributes {stable_mosaic.version = 11 : i64} {
  func.func @fused_forward_kernel(%arg0: memref<2x768xf32, #tpu.memory_space<vmem>>, %arg1: memref<16x24xf32, #tpu.memory_space<vmem>>, %arg2: memref<1x16xf32, #tpu.memory_space<vmem>>, %arg3: memref<768x32xf32, #tpu.memory_space<vmem>>, %arg4: memref<24x48xf32, #tpu.memory_space<vmem>>, %arg5: memref<48x32xf32, #tpu.memory_space<vmem>>, %arg6: memref<32x32xf32, #tpu.memory_space<vmem>>, %arg7: memref<16x64xf32, #tpu.memory_space<vmem>>, %arg8: memref<64x128xf32, #tpu.memory_space<vmem>>, %arg9: memref<128x32xf32, #tpu.memory_space<vmem>>, %arg10: memref<11x128xf32, #tpu.memory_space<vmem>>, %arg11: memref<1x1xf32, #tpu.memory_space<smem>>, %arg12: memref<1x1xf32, #tpu.memory_space<vmem>>) attributes {dimension_semantics = [], scalar_prefetch = 0 : i64, scratch_operands = 0 : i64, tpu.core_type = #tpu.core_type<tc>} {
    %c0 = arith.constant 0 : index
    %c0_0 = arith.constant 0 : index
    %0 = vector.load %arg10[%c0, %c0_0] : memref<11x128xf32, #tpu.memory_space<vmem>>, vector<11x128xf32>
    %1 = vector.extract_strided_slice %0 {offsets = [0, 0], sizes = [1, 32], strides = [1, 1]} : vector<11x128xf32> to vector<1x32xf32>
    %2 = vector.extract_strided_slice %0 {offsets = [1, 0], sizes = [1, 48], strides = [1, 1]} : vector<11x128xf32> to vector<1x48xf32>
    %3 = vector.extract_strided_slice %0 {offsets = [2, 0], sizes = [1, 32], strides = [1, 1]} : vector<11x128xf32> to vector<1x32xf32>
    %4 = vector.extract_strided_slice %0 {offsets = [3, 0], sizes = [1, 32], strides = [1, 1]} : vector<11x128xf32> to vector<1x32xf32>
    %5 = vector.extract_strided_slice %0 {offsets = [4, 0], sizes = [1, 32], strides = [1, 1]} : vector<11x128xf32> to vector<1x32xf32>
    %6 = vector.extract_strided_slice %0 {offsets = [5, 0], sizes = [1, 32], strides = [1, 1]} : vector<11x128xf32> to vector<1x32xf32>
    %7 = vector.extract_strided_slice %0 {offsets = [6, 0], sizes = [1, 64], strides = [1, 1]} : vector<11x128xf32> to vector<1x64xf32>
    %8 = vector.extract_strided_slice %0 {offsets = [7, 0], sizes = [1, 128], strides = [1, 1]} : vector<11x128xf32> to vector<1x128xf32>
    %9 = vector.extract_strided_slice %0 {offsets = [8, 0], sizes = [1, 32], strides = [1, 1]} : vector<11x128xf32> to vector<1x32xf32>
    %10 = vector.extract_strided_slice %0 {offsets = [9, 0], sizes = [1, 32], strides = [1, 1]} : vector<11x128xf32> to vector<1x32xf32>
    %11 = vector.extract_strided_slice %0 {offsets = [10, 0], sizes = [1, 32], strides = [1, 1]} : vector<11x128xf32> to vector<1x32xf32>
    %c0_1 = arith.constant 0 : index
    %c0_2 = arith.constant 0 : index
    %12 = vector.load %arg0[%c0_1, %c0_2] : memref<2x768xf32, #tpu.memory_space<vmem>>, vector<2x768xf32>
    %c0_3 = arith.constant 0 : index
    %c0_4 = arith.constant 0 : index
    %13 = vector.load %arg3[%c0_3, %c0_4] : memref<768x32xf32, #tpu.memory_space<vmem>>, vector<768x32xf32>
    %cst = arith.constant dense<0.000000e+00> : vector<2x32xf32>
    %14 = tpu.matmul %12, %13, %cst {dimension_numbers = #tpu.dot_dimension_numbers<[1], [0], [0], [1], [0, 0, 1, 1], [], []>} : vector<2x768xf32>, vector<768x32xf32>, vector<2x32xf32> -> vector<2x32xf32>
    %15 = vector.broadcast %1 : vector<1x32xf32> to vector<2x32xf32>
    %16 = arith.addf %14, %15 : vector<2x32xf32>
    %c0_5 = arith.constant 0 : index
    %c0_6 = arith.constant 0 : index
    %17 = vector.load %arg1[%c0_5, %c0_6] : memref<16x24xf32, #tpu.memory_space<vmem>>, vector<16x24xf32>
    %c0_7 = arith.constant 0 : index
    %c0_8 = arith.constant 0 : index
    %18 = vector.load %arg4[%c0_7, %c0_8] : memref<24x48xf32, #tpu.memory_space<vmem>>, vector<24x48xf32>
    %cst_9 = arith.constant dense<0.000000e+00> : vector<16x48xf32>
    %19 = tpu.matmul %17, %18, %cst_9 {dimension_numbers = #tpu.dot_dimension_numbers<[1], [0], [0], [1], [0, 0, 1, 1], [], []>} : vector<16x24xf32>, vector<24x48xf32>, vector<16x48xf32> -> vector<16x48xf32>
    %20 = vector.broadcast %2 : vector<1x48xf32> to vector<16x48xf32>
    %21 = arith.addf %19, %20 : vector<16x48xf32>
    %c0_10 = arith.constant 0 : index
    %c0_11 = arith.constant 0 : index
    %22 = vector.load %arg5[%c0_10, %c0_11] : memref<48x32xf32, #tpu.memory_space<vmem>>, vector<48x32xf32>
    %cst_12 = arith.constant dense<0.000000e+00> : vector<16x32xf32>
    %23 = tpu.matmul %21, %22, %cst_12 {dimension_numbers = #tpu.dot_dimension_numbers<[1], [0], [0], [1], [0, 0, 1, 1], [], []>} : vector<16x48xf32>, vector<48x32xf32>, vector<16x32xf32> -> vector<16x32xf32>
    %24 = vector.broadcast %3 : vector<1x32xf32> to vector<16x32xf32>
    %25 = arith.addf %23, %24 : vector<16x32xf32>
    %cst_13 = arith.constant 5.000000e-01 : f32
    %26 = vector.broadcast %cst_13 : f32 to vector<16x32xf32>
    %27 = arith.mulf %26, %25 : vector<16x32xf32>
    %cst_14 = arith.constant 0.707106769 : f32
    %28 = vector.broadcast %cst_14 : f32 to vector<16x32xf32>
    %29 = arith.mulf %25, %28 : vector<16x32xf32>
    %30 = math.erf %29 : vector<16x32xf32>
    %cst_15 = arith.constant 1.000000e+00 : f32
    %31 = vector.broadcast %cst_15 : f32 to vector<16x32xf32>
    %32 = arith.addf %31, %30 : vector<16x32xf32>
    %33 = arith.mulf %27, %32 : vector<16x32xf32>
    %c0_16 = arith.constant 0 : index
    %c0_17 = arith.constant 0 : index
    %34 = vector.load %arg6[%c0_16, %c0_17] : memref<32x32xf32, #tpu.memory_space<vmem>>, vector<32x32xf32>
    %cst_18 = arith.constant dense<0.000000e+00> : vector<16x32xf32>
    %35 = tpu.matmul %33, %34, %cst_18 {dimension_numbers = #tpu.dot_dimension_numbers<[1], [0], [0], [1], [0, 0, 1, 1], [], []>} : vector<16x32xf32>, vector<32x32xf32>, vector<16x32xf32> -> vector<16x32xf32>
    %36 = vector.broadcast %4 : vector<1x32xf32> to vector<16x32xf32>
    %37 = arith.addf %35, %36 : vector<16x32xf32>
    %cst_19 = arith.constant dense<0.000000e+00> : vector<16xf32>
    %38 = vector.multi_reduction <add>, %37, %cst_19 [1] : vector<16x32xf32> to vector<16xf32>
    %39 = vector.shape_cast %38 : vector<16xf32> to vector<16x1xf32>
    %cst_20 = arith.constant 3.200000e+01 : f32
    %40 = vector.broadcast %cst_20 : f32 to vector<16x1xf32>
    %41 = arith.divf %39, %40 : vector<16x1xf32>
    %42 = vector.broadcast %41 : vector<16x1xf32> to vector<16x32xf32>
    %43 = arith.subf %37, %42 : vector<16x32xf32>
    %44 = arith.mulf %43, %43 : vector<16x32xf32>
    %cst_21 = arith.constant dense<0.000000e+00> : vector<16xf32>
    %45 = vector.multi_reduction <add>, %44, %cst_21 [1] : vector<16x32xf32> to vector<16xf32>
    %46 = vector.shape_cast %45 : vector<16xf32> to vector<16x1xf32>
    %cst_22 = arith.constant 3.200000e+01 : f32
    %47 = vector.broadcast %cst_22 : f32 to vector<16x1xf32>
    %48 = arith.divf %46, %47 : vector<16x1xf32>
    %49 = vector.broadcast %41 : vector<16x1xf32> to vector<16x32xf32>
    %50 = arith.subf %37, %49 : vector<16x32xf32>
    %cst_23 = arith.constant 9.99999974E-6 : f32
    %51 = vector.broadcast %cst_23 : f32 to vector<16x1xf32>
    %52 = arith.addf %48, %51 : vector<16x1xf32>
    %53 = math.rsqrt %52 : vector<16x1xf32>
    %54 = vector.broadcast %53 : vector<16x1xf32> to vector<16x32xf32>
    %55 = arith.mulf %50, %54 : vector<16x32xf32>
    %56 = vector.broadcast %5 : vector<1x32xf32> to vector<16x32xf32>
    %57 = arith.mulf %55, %56 : vector<16x32xf32>
    %58 = vector.broadcast %6 : vector<1x32xf32> to vector<16x32xf32>
    %59 = arith.addf %57, %58 : vector<16x32xf32>
    %c0_24 = arith.constant 0 : index
    %c0_25 = arith.constant 0 : index
    %60 = vector.load %arg2[%c0_24, %c0_25] : memref<1x16xf32, #tpu.memory_space<vmem>>, vector<1x16xf32>
    %c0_26 = arith.constant 0 : index
    %c0_27 = arith.constant 0 : index
    %61 = vector.load %arg7[%c0_26, %c0_27] : memref<16x64xf32, #tpu.memory_space<vmem>>, vector<16x64xf32>
    %cst_28 = arith.constant dense<0.000000e+00> : vector<1x64xf32>
    %62 = tpu.matmul %60, %61, %cst_28 {dimension_numbers = #tpu.dot_dimension_numbers<[1], [0], [0], [1], [0, 0, 1, 1], [], []>} : vector<1x16xf32>, vector<16x64xf32>, vector<1x64xf32> -> vector<1x64xf32>
    %63 = arith.addf %62, %7 : vector<1x64xf32>
    %cst_29 = arith.constant 0.000000e+00 : f32
    %64 = vector.broadcast %cst_29 : f32 to vector<1x64xf32>
    %65 = arith.maximumf %63, %64 : vector<1x64xf32>
    %c0_30 = arith.constant 0 : index
    %c0_31 = arith.constant 0 : index
    %66 = vector.load %arg8[%c0_30, %c0_31] : memref<64x128xf32, #tpu.memory_space<vmem>>, vector<64x128xf32>
    %cst_32 = arith.constant dense<0.000000e+00> : vector<1x128xf32>
    %67 = tpu.matmul %65, %66, %cst_32 {dimension_numbers = #tpu.dot_dimension_numbers<[1], [0], [0], [1], [0, 0, 1, 1], [], []>} : vector<1x64xf32>, vector<64x128xf32>, vector<1x128xf32> -> vector<1x128xf32>
    %68 = arith.addf %67, %8 : vector<1x128xf32>
    %cst_33 = arith.constant 0.000000e+00 : f32
    %69 = vector.broadcast %cst_33 : f32 to vector<1x128xf32>
    %70 = arith.maximumf %68, %69 : vector<1x128xf32>
    %c0_34 = arith.constant 0 : index
    %c0_35 = arith.constant 0 : index
    %71 = vector.load %arg9[%c0_34, %c0_35] : memref<128x32xf32, #tpu.memory_space<vmem>>, vector<128x32xf32>
    %cst_36 = arith.constant dense<0.000000e+00> : vector<1x32xf32>
    %72 = tpu.matmul %70, %71, %cst_36 {dimension_numbers = #tpu.dot_dimension_numbers<[1], [0], [0], [1], [0, 0, 1, 1], [], []>} : vector<1x128xf32>, vector<128x32xf32>, vector<1x32xf32> -> vector<1x32xf32>
    %73 = arith.addf %72, %9 : vector<1x32xf32>
    %cst_37 = arith.constant dense<0.000000e+00> : vector<1xf32>
    %74 = vector.multi_reduction <add>, %73, %cst_37 [1] : vector<1x32xf32> to vector<1xf32>
    %75 = vector.shape_cast %74 : vector<1xf32> to vector<1x1xf32>
    %cst_38 = arith.constant 3.200000e+01 : f32
    %76 = vector.broadcast %cst_38 : f32 to vector<1x1xf32>
    %77 = arith.divf %75, %76 : vector<1x1xf32>
    %78 = vector.broadcast %77 : vector<1x1xf32> to vector<1x32xf32>
    %79 = arith.subf %73, %78 : vector<1x32xf32>
    %80 = arith.mulf %79, %79 : vector<1x32xf32>
    %cst_39 = arith.constant dense<0.000000e+00> : vector<1xf32>
    %81 = vector.multi_reduction <add>, %80, %cst_39 [1] : vector<1x32xf32> to vector<1xf32>
    %82 = vector.shape_cast %81 : vector<1xf32> to vector<1x1xf32>
    %cst_40 = arith.constant 3.200000e+01 : f32
    %83 = vector.broadcast %cst_40 : f32 to vector<1x1xf32>
    %84 = arith.divf %82, %83 : vector<1x1xf32>
    %85 = vector.broadcast %77 : vector<1x1xf32> to vector<1x32xf32>
    %86 = arith.subf %73, %85 : vector<1x32xf32>
    %cst_41 = arith.constant 9.99999974E-6 : f32
    %87 = vector.broadcast %cst_41 : f32 to vector<1x1xf32>
    %88 = arith.addf %84, %87 : vector<1x1xf32>
    %89 = math.rsqrt %88 : vector<1x1xf32>
    %90 = vector.broadcast %89 : vector<1x1xf32> to vector<1x32xf32>
    %91 = arith.mulf %86, %90 : vector<1x32xf32>
    %92 = arith.mulf %91, %10 : vector<1x32xf32>
    %93 = arith.addf %92, %11 : vector<1x32xf32>
    %94 = tpu.iota {dimensions = array<i32: 0>} : vector<2x16xi32>
    %95 = tpu.iota {dimensions = array<i32: 1>} : vector<2x16xi32>
    %c8_i32 = arith.constant 8 : i32
    %96 = vector.broadcast %c8_i32 : i32 to vector<2x16xi32>
    %97 = arith.muli %94, %96 : vector<2x16xi32>
    %98 = arith.cmpi sge, %95, %97 : vector<2x16xi32>
    %c8_i32_42 = arith.constant 8 : i32
    %99 = vector.broadcast %c8_i32_42 : i32 to vector<2x16xi32>
    %100 = arith.addi %97, %99 : vector<2x16xi32>
    %101 = arith.cmpi slt, %95, %100 : vector<2x16xi32>
    %102 = arith.andi %98, %101 : vector<2x16xi1>
    %cst_43 = arith.constant 1.250000e-01 : f32
    %cst_44 = arith.constant 0.000000e+00 : f32
    %103 = vector.broadcast %cst_43 : f32 to vector<2x16xf32>
    %104 = vector.broadcast %cst_44 : f32 to vector<2x16xf32>
    %105 = arith.select %102, %103, %104 : vector<2x16xi1>, vector<2x16xf32>
    %cst_45 = arith.constant dense<0.000000e+00> : vector<2x32xf32>
    %106 = tpu.matmul %105, %59, %cst_45 {dimension_numbers = #tpu.dot_dimension_numbers<[1], [0], [0], [1], [0, 0, 1, 1], [], []>} : vector<2x16xf32>, vector<16x32xf32>, vector<2x32xf32> -> vector<2x32xf32>
    %107 = vector.broadcast %93 : vector<1x32xf32> to vector<2x32xf32>
    %108 = arith.addf %106, %107 : vector<2x32xf32>
    %cst_46 = arith.constant 5.000000e-01 : f32
    %109 = vector.broadcast %cst_46 : f32 to vector<2x32xf32>
    %110 = arith.mulf %109, %108 : vector<2x32xf32>
    %c0_47 = arith.constant 0 : index
    %c0_48 = arith.constant 0 : index
    %111 = memref.load %arg11[%c0_47, %c0_48] : memref<1x1xf32, #tpu.memory_space<smem>>
    %cst_49 = arith.constant 2.500000e+00 : f32
    %cst_50 = arith.constant 3.000000e+00 : f32
    %112 = arith.maximumf %cst_49, %111 : f32
    %113 = arith.minimumf %cst_50, %112 : f32
    %114 = vector.broadcast %113 : f32 to vector<1x1xf32>
    %115 = math.exp %114 : vector<1x1xf32>
    %116 = arith.mulf %16, %16 : vector<2x32xf32>
    %cst_51 = arith.constant dense<0.000000e+00> : vector<2xf32>
    %117 = vector.multi_reduction <add>, %116, %cst_51 [1] : vector<2x32xf32> to vector<2xf32>
    %118 = vector.shape_cast %117 : vector<2xf32> to vector<2x1xf32>
    %119 = math.sqrt %118 : vector<2x1xf32>
    %cst_52 = arith.constant 9.99999996E-13 : f32
    %120 = vector.broadcast %cst_52 : f32 to vector<2x1xf32>
    %121 = arith.maximumf %119, %120 : vector<2x1xf32>
    %122 = vector.broadcast %121 : vector<2x1xf32> to vector<2x32xf32>
    %123 = arith.divf %16, %122 : vector<2x32xf32>
    %124 = arith.mulf %110, %110 : vector<2x32xf32>
    %cst_53 = arith.constant dense<0.000000e+00> : vector<2xf32>
    %125 = vector.multi_reduction <add>, %124, %cst_53 [1] : vector<2x32xf32> to vector<2xf32>
    %126 = vector.shape_cast %125 : vector<2xf32> to vector<2x1xf32>
    %127 = math.sqrt %126 : vector<2x1xf32>
    %cst_54 = arith.constant 9.99999996E-13 : f32
    %128 = vector.broadcast %cst_54 : f32 to vector<2x1xf32>
    %129 = arith.maximumf %127, %128 : vector<2x1xf32>
    %130 = vector.broadcast %129 : vector<2x1xf32> to vector<2x32xf32>
    %131 = arith.divf %110, %130 : vector<2x32xf32>
    %cst_55 = arith.constant dense<0.000000e+00> : vector<2x2xf32>
    %132 = tpu.matmul %123, %131, %cst_55 {dimension_numbers = #tpu.dot_dimension_numbers<[1], [1], [0], [0], [0, 0, 1, 0], [], []>} : vector<2x32xf32>, vector<2x32xf32>, vector<2x2xf32> -> vector<2x2xf32>
    %133 = vector.broadcast %115 : vector<1x1xf32> to vector<2x2xf32>
    %134 = arith.mulf %132, %133 : vector<2x2xf32>
    %cst_56 = arith.constant dense<0xFF800000> : vector<2xf32>
    %135 = vector.multi_reduction <maximumf>, %134, %cst_56 [1] : vector<2x2xf32> to vector<2xf32>
    %136 = vector.shape_cast %135 : vector<2xf32> to vector<2x1xf32>
    %cst_57 = arith.constant dense<0xFF800000> : vector<1xf32>
    %137 = vector.multi_reduction <maximumf>, %136, %cst_57 [0] : vector<2x1xf32> to vector<1xf32>
    %138 = vector.shape_cast %137 : vector<1xf32> to vector<1x1xf32>
    %139 = vector.broadcast %138 : vector<1x1xf32> to vector<2x2xf32>
    %140 = arith.subf %134, %139 : vector<2x2xf32>
    %141 = math.exp %140 : vector<2x2xf32>
    %cst_58 = arith.constant dense<0.000000e+00> : vector<2xf32>
    %142 = vector.multi_reduction <add>, %141, %cst_58 [1] : vector<2x2xf32> to vector<2xf32>
    %143 = vector.shape_cast %142 : vector<2xf32> to vector<2x1xf32>
    %144 = math.log %143 : vector<2x1xf32>
    %145 = vector.broadcast %138 : vector<1x1xf32> to vector<2x1xf32>
    %146 = arith.addf %144, %145 : vector<2x1xf32>
    %cst_59 = arith.constant dense<0.000000e+00> : vector<2xf32>
    %147 = vector.multi_reduction <add>, %141, %cst_59 [0] : vector<2x2xf32> to vector<2xf32>
    %148 = vector.shape_cast %147 : vector<2xf32> to vector<1x2xf32>
    %149 = math.log %148 : vector<1x2xf32>
    %150 = vector.broadcast %138 : vector<1x1xf32> to vector<1x2xf32>
    %151 = arith.addf %149, %150 : vector<1x2xf32>
    %152 = tpu.iota {dimensions = array<i32: 0>} : vector<2x2xi32>
    %153 = tpu.iota {dimensions = array<i32: 1>} : vector<2x2xi32>
    %154 = arith.cmpi eq, %152, %153 : vector<2x2xi32>
    %cst_60 = arith.constant 0.000000e+00 : f32
    %155 = vector.broadcast %cst_60 : f32 to vector<2x2xf32>
    %156 = arith.select %154, %134, %155 : vector<2x2xi1>, vector<2x2xf32>
    %cst_61 = arith.constant dense<0.000000e+00> : vector<2xf32>
    %157 = vector.multi_reduction <add>, %156, %cst_61 [1] : vector<2x2xf32> to vector<2xf32>
    %158 = vector.shape_cast %157 : vector<2xf32> to vector<2x1xf32>
    %cst_62 = arith.constant dense<0.000000e+00> : vector<1xf32>
    %159 = vector.multi_reduction <add>, %146, %cst_62 [0] : vector<2x1xf32> to vector<1xf32>
    %160 = vector.shape_cast %159 : vector<1xf32> to vector<1x1xf32>
    %cst_63 = arith.constant dense<0.000000e+00> : vector<1xf32>
    %161 = vector.multi_reduction <add>, %151, %cst_63 [1] : vector<1x2xf32> to vector<1xf32>
    %162 = vector.shape_cast %161 : vector<1xf32> to vector<1x1xf32>
    %cst_64 = arith.constant dense<0.000000e+00> : vector<1xf32>
    %163 = vector.multi_reduction <add>, %158, %cst_64 [0] : vector<2x1xf32> to vector<1xf32>
    %164 = vector.shape_cast %163 : vector<1xf32> to vector<1x1xf32>
    %165 = arith.addf %160, %162 : vector<1x1xf32>
    %cst_65 = arith.constant 2.000000e+00 : f32
    %166 = vector.broadcast %cst_65 : f32 to vector<1x1xf32>
    %167 = arith.mulf %166, %164 : vector<1x1xf32>
    %168 = arith.subf %165, %167 : vector<1x1xf32>
    %cst_66 = arith.constant 4.000000e+00 : f32
    %169 = vector.broadcast %cst_66 : f32 to vector<1x1xf32>
    %170 = arith.divf %168, %169 : vector<1x1xf32>
    %c0_67 = arith.constant 0 : index
    %c0_68 = arith.constant 0 : index
    %171 = vector.load %arg12[%c0_67, %c0_68] : memref<1x1xf32, #tpu.memory_space<vmem>>, vector<1x1xf32>
    tpu.vector_store %arg12[%c0_67, %c0_68], %170 {strides = array<i32>} : memref<1x1xf32, #tpu.memory_space<vmem>>, vector<1x1xf32>,
    return
  }
}

</mosaic_0001>

<bundles_post_ra>
// kernel: tpu_custom_call.1
= control target key start
LH: loop header
LB: loop body
LE: loop exit
PB: predicated region body
PF: predicated region fallthrough
CT: control target
= control target key end

     0   :  { %v143_v30 = vlaneseq  ;;  %v1592_v31 = vmov 1983009808   ;;  %s2203_s0 = inlined_call_operand.vmem [shape: f32[2,768], index: 0, kind: input, shape index: {}]   ;;  %s2204_s1 = inlined_call_operand.vmem [shape: f32[16,24], index: 1, kind: input, shape index: {}]   ;;  %s2205_s2 = inlined_call_operand.vmem [shape: f32[1,16], index: 2, kind: input, shape index: {}]   ;;  %s2206_s3 = inlined_call_operand.vmem [shape: f32[768,32], index: 3, kind: input, shape index: {}]   ;;  %s2207_s4 = inlined_call_operand.vmem [shape: f32[24,48], index: 4, kind: input, shape index: {}]   ;;  %s2208_s5 = inlined_call_operand.vmem [shape: f32[48,32], index: 5, kind: input, shape index: {}]   ;;  %s2209_s6 = inlined_call_operand.vmem [shape: f32[32,32], index: 6, kind: input, shape index: {}]   ;;  %s2210_s7 = inlined_call_operand.vmem [shape: f32[16,64], index: 7, kind: input, shape index: {}]   ;;  %s2211_s8 = inlined_call_operand.vmem [shape: f32[64,128], index: 8, kind: input, shape index: {}]   ;;  %s2212_s9 = inlined_call_operand.vmem [shape: f32[128,32], index: 9, kind: input, shape index: {}]   ;;  %s2213_s10 = inlined_call_operand.vmem [shape: f32[11,128], index: 10, kind: input, shape index: {}]   ;;  %s2214_s11 = inlined_call_operand.<no memory space> [shape: f32[1,1], index: 11, kind: input, shape index: {}]   ;;  %s2215_s12 = inlined_call_operand.hbm [shape: f32[1,1], index: 12, kind: output, shape index: {}]  }
   0x1   :  { %v78_v0 = vld [vmem:[%s2206_s3 + $0xf8] sm:$0xff]  ;;  %v77_v4 = vld [vmem:[%s2206_s3 + $0xf0] sm:$0xff]  ;;  %v76_v8 = vld [vmem:[%s2206_s3 + $0xe8] sm:$0xff]  ;;  %v151_v32 = vunpack.c.l.s4 %v1592_v31 }
   0x2   :  { %v110_v1 = vld [vmem:[%s2206_s3 + $0x1f8] sm:$0xff]  ;;  %1271 = vmatprep.subr.mxu0 %v78_v0  ;;  %v109_v5 = vld [vmem:[%s2206_s3 + $0x1f0] sm:$0xff]  ;;  %v108_v9 = vld [vmem:[%s2206_s3 + $0x1e8] sm:$0xff]  ;;  %v1778_v41 = vshrl.u32 %v143_v30, 7 }
   0x3   :  { %v62_v2 = vld [vmem:[%s2206_s3 + $0x78] sm:$0xff]  ;;  %1306 = vmatprep.subr.mxu1 %v110_v1  ;;  %v61_v6 = vld [vmem:[%s2206_s3 + $0x70] sm:$0xff]  ;;  %v60_v10 = vld [vmem:[%s2206_s3 + $0x68] sm:$0xff]  ;;  %v152_v42 = vunpack.c.0.s8 %v151_v32 }
   0x4   :  { %v94_v3 = vld [vmem:[%s2206_s3 + $0x178] sm:$0xff]  ;;  %1272 = vmatpush3.msra.mxu0 %v62_v2  ;;  %v93_v7 = vld [vmem:[%s2206_s3 + $0x170] sm:$0xff]  ;;  %v92_v11 = vld [vmem:[%s2206_s3 + $0x168] sm:$0xff] }
   0x5   :  { %1307 = vmatpush3.msra.mxu1 %v94_v3  ;;  %1273 = vmatprep.subr.mxu0 %v77_v4  ;;  %v75_v12 = vld [vmem:[%s2206_s3 + $0xe0] sm:$0xff]  ;;  %v74_v16 = vld [vmem:[%s2206_s3 + $0xd8] sm:$0xff]  ;;  %v73_v20 = vld [vmem:[%s2206_s3 + $0xd0] sm:$0xff]  ;;  %v155_v51 = vsub.s32 %v152_v42, %v1778_v41 }
   0x6   :  { %1308 = vmatprep.subr.mxu1 %v109_v5  ;;  %1274 = vmatpush3.msra.mxu0 %v61_v6  ;;  %v107_v13 = vld [vmem:[%s2206_s3 + $0x1e0] sm:$0xff]  ;;  %v106_v17 = vld [vmem:[%s2206_s3 + $0x1d8] sm:$0xff]  ;;  %v105_v21 = vld [vmem:[%s2206_s3 + $0x1d0] sm:$0xff] }
   0x7   :  { %1309 = vmatpush3.msra.mxu1 %v93_v7  ;;  %1275 = vmatprep.subr.mxu0 %v76_v8  ;;  %v59_v14 = vld [vmem:[%s2206_s3 + $0x60] sm:$0xff]  ;;  %v58_v18 = vld [vmem:[%s2206_s3 + $0x58] sm:$0xff]  ;;  %v57_v22 = vld [vmem:[%s2206_s3 + $0x50] sm:$0xff] }
   0x8   :  { %1310 = vmatprep.subr.mxu1 %v108_v9  ;;  %v91_v15 = vld [vmem:[%s2206_s3 + $0x160] sm:$0xff]  ;;  %1276 = vmatpush3.msra.mxu0 %v60_v10  ;;  %v90_v19 = vld [vmem:[%s2206_s3 + $0x158] sm:$0xff]  ;;  %v89_v23 = vld [vmem:[%s2206_s3 + $0x150] sm:$0xff] }
   0x9   :  { %1311 = vmatpush3.msra.mxu1 %v92_v11  ;;  %1277 = vmatprep.subr.mxu0 %v75_v12  ;;  %v72_v24 = vld [vmem:[%s2206_s3 + $0xc8] sm:$0xff]  ;;  %v71_v28 = vld [vmem:[%s2206_s3 + $0xc0] sm:$0xff]  ;;  %v70_v35 = vld [vmem:[%s2206_s3 + $0xb8] sm:$0xff] }
   0xa   :  { %1312 = vmatprep.subr.mxu1 %v107_v13  ;;  %1278 = vmatpush3.msra.mxu0 %v59_v14  ;;  %v104_v25 = vld [vmem:[%s2206_s3 + $0x1c8] sm:$0xff]  ;;  %v103_v29 = vld [vmem:[%s2206_s3 + $0x1c0] sm:$0xff]  ;;  %v102_v36 = vld [vmem:[%s2206_s3 + $0x1b8] sm:$0xff] }
   0xb   :  { %1313 = vmatpush3.msra.mxu1 %v91_v15  ;;  %1279 = vmatprep.subr.mxu0 %v74_v16  ;;  %v56_v26 = vld [vmem:[%s2206_s3 + $0x48] sm:$0xff]  ;;  %v55_v33 = vld [vmem:[%s2206_s3 + $0x40] sm:$0xff]  ;;  %v54_v37 = vld [vmem:[%s2206_s3 + $0x38] sm:$0xff] }
   0xc   :  { %1314 = vmatprep.subr.mxu1 %v106_v17  ;;  %1280 = vmatpush3.msra.mxu0 %v58_v18  ;;  %v88_v27 = vld [vmem:[%s2206_s3 + $0x148] sm:$0xff]  ;;  %v87_v34 = vld [vmem:[%s2206_s3 + $0x140] sm:$0xff]  ;;  %v86_v38 = vld [vmem:[%s2206_s3 + $0x138] sm:$0xff] }
   0xd   :  { %1315 = vmatpush3.msra.mxu1 %v90_v19  ;;  %1281 = vmatprep.subr.mxu0 %v73_v20  ;;  %v69_v39 = vld [vmem:[%s2206_s3 + $0xb0] sm:$0xff]  ;;  %v68_v45 = vld [vmem:[%s2206_s3 + $0xa8] sm:$0xff]  ;;  %v67_v49 = vld [vmem:[%s2206_s3 + $0xa0] sm:$0xff] }
   0xe   :  { %1316 = vmatprep.subr.mxu1 %v105_v21  ;;  %1282 = vmatpush3.msra.mxu0 %v57_v22  ;;  %v101_v40 = vld [vmem:[%s2206_s3 + $0x1b0] sm:$0xff]  ;;  %v100_v46 = vld [vmem:[%s2206_s3 + $0x1a8] sm:$0xff]  ;;  %v99_v50 = vld [vmem:[%s2206_s3 + $0x1a0] sm:$0xff] }
   0xf   :  { %1317 = vmatpush3.msra.mxu1 %v89_v23  ;;  %1283 = vmatprep.subr.mxu0 %v72_v24  ;;  %v53_v43 = vld [vmem:[%s2206_s3 + $0x30] sm:$0xff]  ;;  %v52_v47 = vld [vmem:[%s2206_s3 + $0x28] sm:$0xff]  ;;  %v51_v52 = vld [vmem:[%s2206_s3 + $0x20] sm:$0xff] }
  0x10   :  { %1318 = vmatprep.subr.mxu1 %v104_v25  ;;  %1284 = vmatpush3.msra.mxu0 %v56_v26  ;;  %v85_v44 = vld [vmem:[%s2206_s3 + $0x130] sm:$0xff]  ;;  %v84_v48 = vld [vmem:[%s2206_s3 + $0x128] sm:$0xff]  ;;  %v83_v53 = vld [vmem:[%s2206_s3 + $0x120] sm:$0xff] }
  0x11   :  { %1319 = vmatpush3.msra.mxu1 %v88_v27  ;;  %1285 = vmatprep.subr.mxu0 %v71_v28  ;;  %v45_v54 = vld [vmem:[%s2203_s0] sm:$0xff]  ;;  %v66_v55 = vld [vmem:[%s2206_s3 + $0x98] sm:$0xff]  ;;  %v65_v60 = vld [vmem:[%s2206_s3 + $0x90] sm:$0xff] }
  0x12   :  { %1320 = vmatprep.subr.mxu1 %v103_v29  ;;  %1286 = vmatpush3.msra.mxu0 %v55_v33  ;;  %v98_v56 = vld [vmem:[%s2206_s3 + $0x198] sm:$0xff]  ;;  %v149_v57 = vcombine.high %v45_v54, %v45_v54  ;;  %v97_v61 = vld [vmem:[%s2206_s3 + $0x190] sm:$0xff]  ;;  %v156_v62 = vrot.slane %v45_v54, %v155_v51  ;;  %v64_v2 = vld [vmem:[%s2206_s3 + $0x88] sm:$0xff] }
  0x13   :  { %1321 = vmatpush3.msra.mxu1 %v87_v34  ;;  %1287 = vmatprep.subr.mxu0 %v70_v35  ;;  %v50_v58 = vld [vmem:[%s2206_s3 + $0x18] sm:$0xff]  ;;  %v49_v63 = vld [vmem:[%s2206_s3 + $0x10] sm:$0xff]  ;;  %v96_v3 = vld [vmem:[%s2206_s3 + $0x188] sm:$0xff] }
  0x14   :  { %1322 = vmatprep.subr.mxu1 %v102_v36  ;;  %1288 = vmatpush3.msra.mxu0 %v54_v37  ;;  %v82_v59 = vld [vmem:[%s2206_s3 + $0x118] sm:$0xff]  ;;  %v81_v0 = vld [vmem:[%s2206_s3 + $0x110] sm:$0xff]  ;;  %v163_v1 = vrot.slane %v149_v57, %v155_v51  ;;  %v48_v4 = vld [vmem:[%s2206_s3 + $0x8] sm:$0xff]  ;;  %v164_v8 = vcombine.high %v156_v62, %v156_v62 }
  0x15   :  { %1323 = vmatpush3.msra.mxu1 %v86_v38  ;;  %1289 = vmatprep.subr.mxu0 %v69_v39  ;;  %v80_v5 = vld [vmem:[%s2206_s3 + $0x108] sm:$0xff]  ;;  %v63_v6 = vld [vmem:[%s2206_s3 + $0x80] sm:$0xff]  ;;  %v142_v12 = vld [vmem:[%s2206_s3 + $0x2f8] sm:$0xff] }
  0x16   :  { %1324 = vmatprep.subr.mxu1 %v101_v40  ;;  %1290 = vmatpush3.msra.mxu0 %v53_v43  ;;  %v95_v7 = vld [vmem:[%s2206_s3 + $0x180] sm:$0xff]  ;;  %v165_v10 = vcombine.high %v163_v1, %v163_v1  ;;  %v394_v13 = vld [vmem:[%s2207_s4 + $0x10] sm:$0xff]  ;;  %v126_v14 = vld [vmem:[%s2206_s3 + $0x278] sm:$0xff] }
  0x17   :  { %1325 = vmatpush3.msra.mxu1 %v85_v44  ;;  %1291 = vmatprep.subr.mxu0 %v68_v45  ;;  %v47_v9 = vld [vmem:[%s2206_s3] sm:$0xff]  ;;  %v141_v15 = vld [vmem:[%s2206_s3 + $0x2f0] sm:$0xff]  ;;  %v393_v16 = vld [vmem:[%s2207_s4 + $0x8] sm:$0xff] }
  0x18   :  { %1326 = vmatprep.subr.mxu1 %v100_v46  ;;  %1292 = vmatpush3.msra.mxu0 %v52_v47  ;;  %v79_v11 = vld [vmem:[%s2206_s3 + $0x100] sm:$0xff] }
  0x19   :  { %1327 = vmatpush3.msra.mxu1 %v84_v48  ;;  %1293 = vmatprep.subr.mxu0 %v67_v49 }
  0x1a   :  { %1328 = vmatprep.subr.mxu1 %v99_v50  ;;  %1294 = vmatpush3.msra.mxu0 %v51_v52 }
  0x1b   :  { %1329 = vmatpush3.msra.mxu1 %v83_v53  ;;  %1295 = vmatprep.subr.mxu0 %v66_v55 }
  0x1c   :  { %1330 = vmatprep.subr.mxu1 %v98_v56  ;;  %1296 = vmatpush3.msra.mxu0 %v50_v58 }
  0x1d   :  { %1331 = vmatpush3.msra.mxu1 %v82_v59  ;;  %1297 = vmatprep.subr.mxu0 %v65_v60 }
  0x1e   :  { %1332 = vmatprep.subr.mxu1 %v97_v61  ;;  %1298 = vmatpush3.msra.mxu0 %v49_v63 }
  0x1f   :  { %1333 = vmatpush3.msra.mxu1 %v81_v0  ;;  %1299 = vmatprep.subr.mxu0 %v64_v2 }
  0x20   :  { %1334 = vmatprep.subr.mxu1 %v96_v3  ;;  %1300 = vmatpush3.msra.mxu0 %v48_v4 }
  0x21   :  { %1335 = vmatpush3.msra.mxu1 %v80_v5  ;;  %1301 = vmatprep.subr.mxu0 %v63_v6 }
  0x22   :  { %1336 = vmatprep.subr.mxu1 %v95_v7  ;;  %1302 = vmatpush3.msra.mxu0 %v47_v9 }
  0x23   :  { %244 = vmatprep.mubr.f32.mxu0 %v164_v8  ;;  %1337 = vmatpush3.msra.mxu1 %v79_v11 }
  0x24   :  { %314 = vmatprep.mubr.f32.mxu1 %v165_v10  ;;  %245 = vmatmul.mubr.f32.vlgmr.msra.gmra.mxu0 %v156_v62 }
  0x25   :  { %315 = vmatmul.mubr.f32.vlgmr.msra.gmra.mxu1 %v163_v1 }
  0x26   :  { %18 = vsyncpa [#allocation4], 0  ;;  %1341 = vmatprep.subr.mxu0 %v142_v12  ;;  %1429 = vmatprep.subr.mxu1 %v394_v13  ;;  %v125_v17 = vld [vmem:[%s2206_s3 + $0x270] sm:$0xff]  ;;  %v140_v18 = vld [vmem:[%s2206_s3 + $0x2e8] sm:$0xff]  ;;  %vm399_vm0 = vcmask 195584   ;;  %v145_v59 = vsub.s32 0, %v1778_v41 }
  0x27   :  { %1342 = vmatpush3.msra.mxu0 %v126_v14  ;;  %1430 = vmatpush3.msra.mxu1 %v394_v13  ;;  %v392_v19 = vld [vmem:[%s2207_s4] sm:$0xff]  ;;  %v1889_v20 = vld.sshfl [vmem:[%s2203_s0 + $0x8] sm:$0x33 pattern:$0x76325410]  ;;  %v138_v27 = vld [vmem:[%s2206_s3 + $0x2d8] sm:$0xff] }
  0x28   :  { %1343 = vmatprep.subr.mxu0 %v141_v15  ;;  %1431 = vmatprep.subr.mxu1 %v393_v16  ;;  %v124_v21 = vld [vmem:[%s2206_s3 + $0x268] sm:$0xff]  ;;  %v390_v22 = vld [vmem:[%s2204_s1] sm:$0xff]  ;;  %v173_v26 = vcombine.high %v1889_v20, %v1889_v20  ;;  %v122_v28 = vld [vmem:[%s2206_s3 + $0x258] sm:$0xff]  ;;  %v397_v4 = vsub.s32 1, %v1778_v41  ;;  %vm491_vm1 = vcmask 392192   ;;  %vm1594_vm2 = vmmov 0  }
  0x29   :  { %1344 = vmatpush3.msra.mxu0 %v125_v17  ;;  %1432 = vmatpush3.msra.mxu1 %v393_v16  ;;  %v139_v23 = vld [vmem:[%s2206_s3 + $0x2e0] sm:$0xff]  ;;  %v391_v24 = vld [vmem:[%s2204_s1 + $0x8] sm:$0xff]  ;;  %v137_v29 = vld [vmem:[%s2206_s3 + $0x2d0] sm:$0xff]  ;;  %vm591_vm3 = vcmask 261120   ;;  %vm718_vm4 = vcmask 130048   ;;  %vm803_vm5 = vcmask 523264  }
  0x2a   :  { %1345 = vmatprep.subr.mxu0 %v140_v18  ;;  %1433 = vmatprep.subr.mxu1 %v392_v19  ;;  %v123_v25 = vld [vmem:[%s2206_s3 + $0x260] sm:$0xff]  ;;  %v121_v31 = vld [vmem:[%s2206_s3 + $0x250] sm:$0xff]  ;;  %v136_v32 = vld [vmem:[%s2206_s3 + $0x2c8] sm:$0xff]  ;;  %vm964_vm9 = vcmask 253952   ;;  %vm1080_vm10 = vcmask 254976   ;;  %s1596_s22 = smov 3.0  }
  0x2b   :  { %1346 = vmatpush3.msra.mxu0 %v124_v21  ;;  %1434 = vmatpush3.msra.mxu1 %v392_v19  ;;  %v120_v33 = vld [vmem:[%s2206_s3 + $0x248] sm:$0xff]  ;;  %v135_v34 = vld [vmem:[%s2206_s3 + $0x2c0] sm:$0xff]  ;;  %v134_v36 = vld [vmem:[%s2206_s3 + $0x2b8] sm:$0xff]  ;;  %v489_v21 = vsub.s32 2, %v1778_v41  ;;  %vm1185_vm15 = vcmask 9216  }
  0x2c   :  { %1435 = vmatprep.mubr.msk.f32.mxu1 %vm399_vm0, %v390_v22  ;;  %1347 = vmatprep.subr.mxu0 %v139_v23  ;;  %v119_v35 = vld [vmem:[%s2206_s3 + $0x240] sm:$0xff]  ;;  %v118_v37 = vld [vmem:[%s2206_s3 + $0x238] sm:$0xff]  ;;  %v133_v38 = vld [vmem:[%s2206_s3 + $0x2b0] sm:$0xff] }
  0x2d   :  { %1436 = vmatmul.mubr.msk.f32.vlgmr.msra.gmra.mxu1 %vm399_vm0, %v391_v24  ;;  %1348 = vmatpush3.msra.mxu0 %v123_v25  ;;  %v117_v39 = vld [vmem:[%s2206_s3 + $0x230] sm:$0xff]  ;;  %v132_v40 = vld [vmem:[%s2206_s3 + $0x2a8] sm:$0xff]  ;;  %v131_v43 = vld [vmem:[%s2206_s3 + $0x2a0] sm:$0xff] }
  0x2e   :  { %1349 = vmatprep.subr.mxu0 %v138_v27  ;;  %384 = vmatprep.mubr.f32.mxu0 %v173_v26  ;;  %v116_v42 = vld [vmem:[%s2206_s3 + $0x228] sm:$0xff]  ;;  %v115_v44 = vld [vmem:[%s2206_s3 + $0x220] sm:$0xff]  ;;  %v130_v45 = vld [vmem:[%s2206_s3 + $0x298] sm:$0xff] }
  0x2f   :  { %1350 = vmatpush3.msra.mxu0 %v122_v28  ;;  %v114_v46 = vld [vmem:[%s2206_s3 + $0x218] sm:$0xff]  ;;  %v129_v47 = vld [vmem:[%s2206_s3 + $0x290] sm:$0xff]  ;;  %v128_v49 = vld [vmem:[%s2206_s3 + $0x288] sm:$0xff] }
  0x30   :  { %1351 = vmatprep.subr.mxu0 %v137_v29  ;;  %v113_v48 = vld [vmem:[%s2206_s3 + $0x210] sm:$0xff]  ;;  %v112_v50 = vld [vmem:[%s2206_s3 + $0x208] sm:$0xff]  ;;  %v127_v51 = vld [vmem:[%s2206_s3 + $0x280] sm:$0xff] }
  0x31   :  { %1352 = vmatpush3.msra.mxu0 %v121_v31  ;;  %v111_v52 = vld [vmem:[%s2206_s3 + $0x200] sm:$0xff]  ;;  %v486_v53 = vld [vmem:[%s2208_s5 + $0x28] sm:$0xff]  ;;  %v484_v55 = vld [vmem:[%s2208_s5 + $0x18] sm:$0xff] }
  0x32   :  { %1353 = vmatprep.subr.mxu0 %v136_v32  ;;  %1438 = vmatprep.subr.mxu1 %v486_v53  ;;  %v485_v54 = vld [vmem:[%s2208_s5 + $0x20] sm:$0xff]  ;;  %v483_v56 = vld [vmem:[%s2208_s5 + $0x10] sm:$0xff]  ;;  %v482_v57 = vld [vmem:[%s2208_s5 + $0x8] sm:$0xff] }
  0x33   :  { %1354 = vmatpush3.msra.mxu0 %v120_v33  ;;  %1439 = vmatpush3.msra.mxu1 %v486_v53  ;;  %v481_v58 = vld [vmem:[%s2208_s5] sm:$0xff]  ;;  %v586_v16 = vld [vmem:[%s2209_s6 + $0x18] sm:$0xff]  ;;  %v585_v17 = vld [vmem:[%s2209_s6 + $0x10] sm:$0xff] }
  0x34   :  { %1355 = vmatprep.subr.mxu0 %v135_v34  ;;  %1440 = vmatprep.subr.mxu1 %v485_v54  ;;  %v2003_v60 = vld [vmem:[%s2213_s10] sm:$0xff]  ;;  %v584_v18 = vld [vmem:[%s2209_s6 + $0x8] sm:$0xff] }
  0x35   :  { %1356 = vmatpush3.msra.mxu0 %v119_v35  ;;  %1441 = vmatpush3.msra.mxu1 %v485_v54  ;;  %v146_v63 = vrot.slane %v2003_v60, %v145_v59  ;;  %v398_v7 = vrot.slane %v2003_v60, %v397_v4  ;;  %v583_v19 = vld [vmem:[%s2209_s6] sm:$0xff]  ;;  %v490_v22 = vrot.slane %v2003_v60, %v489_v21  ;;  %v716_v54 = vrot.slane %v2003_v60, 6 }
  0x36   :  { %1357 = vmatprep.subr.mxu0 %v134_v36  ;;  %1442 = vmatprep.subr.mxu1 %v484_v55  ;;  %v890_v4 = vld [vmem:[%s2212_s9 + $0x60] sm:$0xff] }
  0x37   :  { %1358 = vmatpush3.msra.mxu0 %v118_v37  ;;  %1443 = vmatpush3.msra.mxu1 %v484_v55 }
  0x38   :  { %1359 = vmatprep.subr.mxu0 %v133_v38  ;;  %1444 = vmatprep.subr.mxu1 %v483_v56  ;;  %v714_v38 = vld [vmem:[%s2210_s7 + $0x8] sm:$0xff] }
  0x39   :  { %1360 = vmatpush3.msra.mxu0 %v117_v39  ;;  %1445 = vmatpush3.msra.mxu1 %v483_v56  ;;  %v713_v39 = vld [vmem:[%s2210_s7] sm:$0xff] }
  0x3a   :  { %1361 = vmatprep.subr.mxu0 %v132_v40  ;;  %1446 = vmatprep.subr.mxu1 %v482_v57  ;;  %v712_v40 = vld [vmem:[%s2205_s2] sm:$0x1] }
  0x3b   :  { %1362 = vmatpush3.msra.mxu0 %v116_v42  ;;  %1447 = vmatpush3.msra.mxu1 %v482_v57  ;;  %v800_v42 = vld [vmem:[%s2211_s8 + $0x38] sm:$0xff] }
  0x3c   :  { %1363 = vmatprep.subr.mxu0 %v131_v43  ;;  %1448 = vmatprep.subr.mxu1 %v481_v58  ;;  %v799_v43 = vld [vmem:[%s2211_s8 + $0x30] sm:$0xff] }
  0x3d   :  { %1364 = vmatpush3.msra.mxu0 %v115_v44  ;;  %1449 = vmatpush3.msra.mxu1 %v481_v58  ;;  %v798_v44 = vld [vmem:[%s2211_s8 + $0x28] sm:$0xff] }
  0x3e   :  { %1365 = vmatprep.subr.mxu0 %v130_v45  ;;  %1453 = vmatprep.subr.mxu1 %v586_v16  ;;  %v797_v45 = vld [vmem:[%s2211_s8 + $0x20] sm:$0xff] }
  0x3f   :  { %1366 = vmatpush3.msra.mxu0 %v114_v46  ;;  %v796_v46 = vld [vmem:[%s2211_s8 + $0x18] sm:$0xff] }
  0x40   :  { %1367 = vmatprep.subr.mxu0 %v129_v47  ;;  %v795_v47 = vld [vmem:[%s2211_s8 + $0x10] sm:$0xff] }
  0x41   :  { %1368 = vmatpush3.msra.mxu0 %v113_v48  ;;  %v794_v48 = vld [vmem:[%s2211_s8 + $0x8] sm:$0xff] }
  0x42   :  { %1369 = vmatprep.subr.mxu0 %v128_v49  ;;  %v793_v49 = vld [vmem:[%s2211_s8] sm:$0xff] }
  0x43   :  { %1370 = vmatpush3.msra.mxu0 %v112_v50  ;;  %v589_v50 = vsub.s32 3, %v1778_v41 }
  0x44   :  { %1371 = vmatprep.subr.mxu0 %v127_v51 }
  0x45   :  { %1372 = vmatpush3.msra.mxu0 %v111_v52  ;;  %v590_v51 = vrot.slane %v2003_v60, %v589_v50 }
  0x46   :  { %385 = vmatmul.mubr.f32.vlgmr.msra.gmra.mxu0 %v1889_v20  ;;  %v1593_v20 = vmov 0.0  }
  0x47   :  { %1490 = vmatprep.subr.mxu0 %v1593_v20  ;;  %1522 = vmatprep.mubr.msk.f32.mxu0 %vm1594_vm2, %v1593_v20 }
  0xe4   :  { %v1303_v61 = vpop.f32.mrf.mxu0 }
  0xe5   :  { %v1338_v62 = vpop.f32.mrf.mxu1 }
  0xe6   :  { %v1304_v0 = vpop.f32.mrf.mxu0 }
  0xe7   :  { %v1339_v1 = vpop.f32.mrf.mxu1  ;;  %v1305_v2 = vadd.f32 %v1304_v0, %v1303_v61 }
  0xe8   :  { %v1340_v3 = vadd.f32 %v1339_v1, %v1338_v62  ;;  %v893_v1 = vld [vmem:[%s2212_s9 + $0x78] sm:$0xff] }
  0xe9   :  { %v247_v5 = vadd.f32 %v1305_v2, %v146_v63  ;;  %v892_v2 = vld [vmem:[%s2212_s9 + $0x70] sm:$0xff]  ;;  %1491 = vmatpush3.msra.mxu0 %v893_v1 }
  0xea   :  { %1492 = vmatprep.subr.mxu0 %v1593_v20 }
  0xeb   :  { %v317_v6 = vadd.f32 %v1340_v3, %v247_v5  ;;  %v891_v3 = vld [vmem:[%s2212_s9 + $0x68] sm:$0xff]  ;;  %1493 = vmatpush3.msra.mxu0 %v892_v2  ;;  %v889_v5 = vld [vmem:[%s2212_s9 + $0x58] sm:$0xff] }
  0xec   :  { %1494 = vmatprep.subr.mxu0 %v1593_v20 }
  0xed   :  { %v1437_v8 = vpop.f32.mrf.mxu1  ;;  %1495 = vmatpush3.msra.mxu0 %v891_v3 }
  0xee   :  { %v478_v11 = vadd.f32 %v1437_v8, %v398_v7  ;;  %1496 = vmatprep.subr.mxu0 %v1593_v20  ;;  %v886_v8 = vld [vmem:[%s2212_s9 + $0x40] sm:$0xff] }
  0xef   :  { %v472_v9 = vpop.f32.mrf.mxu1  ;;  %1497 = vmatpush3.msra.mxu0 %v890_v4 }
  0xf0   :  { %v473_v10 = vadd.f32 %v472_v9, %v398_v7  ;;  %1498 = vmatprep.subr.mxu0 %v1593_v20  ;;  %v887_v7 = vld [vmem:[%s2212_s9 + $0x48] sm:$0xff]  ;;  %v885_v9 = vld [vmem:[%s2212_s9 + $0x38] sm:$0xff] }
  0xf1   :  { %1499 = vmatpush3.msra.mxu0 %v889_v5 }
  0xf2   :  { %1450 = vmatprep.mubr.msk.f32.mxu1 %vm491_vm1, %v473_v10  ;;  %1500 = vmatprep.subr.mxu0 %v1593_v20  ;;  %v884_v10 = vld [vmem:[%s2212_s9 + $0x30] sm:$0xff] }
  0xf3   :  { %1451 = vmatmul.mubr.msk.f32.vlgmr.msra.gmra.mxu1 %vm491_vm1, %v478_v11  ;;  %v883_v11 = vld [vmem:[%s2212_s9 + $0x28] sm:$0xff]  ;;  %vm1189_vm1 = vcmask 1041408  }
  0xf4   :  { %1454 = vmatpush3.msra.mxu1 %v586_v16  ;;  %v879_v16 = vld [vmem:[%s2212_s9 + $0x8] sm:$0xff] }
  0xf5   :  { %1455 = vmatprep.subr.mxu1 %v585_v17 }
  0xf6   :  { %1456 = vmatpush3.msra.mxu1 %v585_v17  ;;  %v878_v17 = vld [vmem:[%s2212_s9] sm:$0xff] }
  0xf7   :  { %1457 = vmatprep.subr.mxu1 %v584_v18 }
  0xf8   :  { %1458 = vmatpush3.msra.mxu1 %v584_v18 }
  0xf9   :  { %1459 = vmatprep.subr.mxu1 %v583_v19 }
  0xfa   :  { %1460 = vmatpush3.msra.mxu1 %v583_v19 }
  0xfb   :  { %1464 = vmatprep.subr.mxu1 %v1593_v20 }
 0x106   :  { %v1373_v12 = vpop.f32.mrf.mxu0 }
 0x108   :  { %v1374_v13 = vpop.f32.mrf.mxu0 }
 0x109   :  { %v1375_v14 = vadd.f32 %v1374_v13, %v1373_v12  ;;  %v882_v12 = vld [vmem:[%s2212_s9 + $0x20] sm:$0xff]  ;;  %v881_v13 = vld [vmem:[%s2212_s9 + $0x18] sm:$0xff] }
 0x10b   :  { %v2010_v15 = vadd.f32 %v1375_v14, %v317_v6  ;;  %v888_v6 = vld [vmem:[%s2212_s9 + $0x50] sm:$0xff] }
 0x10c   :  { %1501 = vmatpush3.msra.mxu0 %v888_v6  ;;  %v880_v14 = vld [vmem:[%s2212_s9 + $0x10] sm:$0xff] }
 0x10d   :  { %1502 = vmatprep.subr.mxu0 %v1593_v20  ;;  %v1079_v4 = vmul.f32 %v2010_v15, %v2010_v15 }
 0x10e   :  { %1503 = vmatpush3.msra.mxu0 %v887_v7 }
 0x10f   :  { %1504 = vmatprep.subr.mxu0 %v1593_v20 }
 0x110   :  { %1505 = vmatpush3.msra.mxu0 %v886_v8 }
 0x111   :  { %1506 = vmatprep.subr.mxu0 %v1593_v20 }
 0x112   :  { %1507 = vmatpush3.msra.mxu0 %v885_v9 }
 0x113   :  { %1508 = vmatprep.subr.mxu0 %v1593_v20 }
 0x114   :  { %1509 = vmatpush3.msra.mxu0 %v884_v10 }
 0x115   :  { %1510 = vmatprep.subr.mxu0 %v1593_v20 }
 0x116   :  { %1511 = vmatpush3.msra.mxu0 %v883_v11 }
 0x117   :  { %1512 = vmatprep.subr.mxu0 %v1593_v20 }
 0x118   :  { %1513 = vmatpush3.msra.mxu0 %v882_v12 }
 0x119   :  { %1514 = vmatprep.subr.mxu0 %v1593_v20 }
 0x11a   :  { %1515 = vmatpush3.msra.mxu0 %v881_v13 }
 0x11b   :  { %1516 = vmatprep.subr.mxu0 %v1593_v20 }
 0x11c   :  { %1517 = vmatpush3.msra.mxu0 %v880_v14 }
 0x11d   :  { %1518 = vmatprep.subr.mxu0 %v1593_v20 }
 0x11e   :  { %1519 = vmatpush3.msra.mxu0 %v879_v16 }
 0x11f   :  { %1520 = vmatprep.subr.mxu0 %v1593_v20 }
 0x120   :  { %1521 = vmatpush3.msra.mxu0 %v878_v17 }
 0x1b3   :  { %v1452_v23 = vpop.f32.mrf.mxu1 }
 0x1b4   :  { %v570_v24 = vadd.f32 %v1452_v23, %v490_v22 }
 0x1b5   :  { %v564_v25 = vpop.f32.mrf.mxu1 }
 0x1b6   :  { %v576_v26 = vmul.f32 0.70710677, %v570_v24  ;;  %v565_v27 = vadd.f32 %v564_v25, %v490_v22  ;;  %v574_v35 = vmul.f32 0.5, %v570_v24 }
 0x1b8   :  { %1544 = verf.f32 %v576_v26  ;;  %v575_v28 = vmul.f32 0.70710677, %v565_v27  ;;  %v573_v33 = vmul.f32 0.5, %v565_v27 }
 0x1ba   :  { %1546 = verf.f32 %v575_v28 }
 0x1c5   :  { %v1545_v29 = vpop.eup %1544 }
 0x1c6   :  { %v580_v32 = vadd.f32 1.0, %v1545_v29  ;;  %v801_v29 = vrot.slane %v2003_v60, 7 }
 0x1c7   :  { %v1547_v31 = vpop.eup %1546 }
 0x1c8   :  { %v579_v34 = vadd.f32 1.0, %v1547_v31  ;;  %v582_v37 = vmul.f32 %v580_v32, %v574_v35 }
 0x1ca   :  { %v581_v36 = vmul.f32 %v579_v34, %v573_v33 }
 0x1cc   :  { %1461 = vmatprep.mubr.msk.f32.mxu1 %vm591_vm3, %v581_v36 }
 0x1cd   :  { %1462 = vmatmul.mubr.msk.f32.vlgmr.msra.gmra.mxu1 %vm591_vm3, %v582_v37 }
 0x1ce   :  { %1465 = vmatpush3.msra.mxu1 %v714_v38  ;;  %1468 = vmatprep.mubr.msk.f32.mxu1 %vm1594_vm2, %v1593_v20 }
 0x1cf   :  { %1466 = vmatprep.subr.mxu1 %v1593_v20 }
 0x1d0   :  { %1467 = vmatpush3.msra.mxu1 %v713_v39 }
 0x1d1   :  { %1469 = vmatmul.mubr.msk.f32.vlgmr.msra.gmra.mxu1 %vm718_vm4, %v712_v40  ;;  %1471 = vmatprep.subr.mxu1 %v1593_v20 }
 0x1d2   :  { %1472 = vmatpush3.msra.mxu1 %v800_v42  ;;  %1487 = vmatprep.mubr.msk.f32.mxu1 %vm1594_vm2, %v1593_v20  ;;  %v702_v42 = vsub.s32 4, %v1778_v41 }
 0x1d3   :  { %1473 = vmatprep.subr.mxu1 %v1593_v20 }
 0x1d4   :  { %1474 = vmatpush3.msra.mxu1 %v799_v43  ;;  %v989_v43 = vmul.u32 8, %v1778_v41 }
 0x1d5   :  { %1475 = vmatprep.subr.mxu1 %v1593_v20 }
 0x1d6   :  { %1476 = vmatpush3.msra.mxu1 %v798_v44  ;;  %v708_v44 = vsub.s32 5, %v1778_v41 }
 0x1d7   :  { %1477 = vmatprep.subr.mxu1 %v1593_v20 }
 0x1d8   :  { %1478 = vmatpush3.msra.mxu1 %v797_v45  ;;  %v703_v45 = vrot.slane %v2003_v60, %v702_v42  ;;  %v709_v50 = vrot.slane %v2003_v60, %v708_v44  ;;  %v44_v60 = vld [vmem:[%s2213_s10 + $0x8] sm:$0x7]  ;;  %s1595_s10 = smov 2.5  }
 0x1d9   :  { %1479 = vmatprep.subr.mxu1 %v1593_v20  ;;  %v979_v10 = vrot.slane %v44_v60, 1  ;;  %v982_v12 = vrot.slane %v44_v60, 2  ;;  %s1074_s21 = smax.f32 %s1595_s10, %s2214_s11  ;;  %s1597_s11 = smov [#allocation3]  }
 0x1da   :  { %1480 = vmatpush3.msra.mxu1 %v796_v46  ;;  %v2166_v46 = vand.u32 127, %v143_v30  ;;  %s1075_s23 = smin.f32 %s1596_s22, %s1074_s21  ;;  %s1251_s24 = sshll.u32 %s1597_s11, 4  ;;  %s1252_s24 = int_to_ptr.vmem [resolvable:$true] %s1251_s24 }
 0x1db   :  { %1481 = vmatprep.subr.mxu1 %v1593_v20  ;;  %v1076_v42 = vstv %s1075_s23  ;;  %s1570_s25 = scalar_lea.vmem %s1252_s24, 16  ;;  %s1574_s7 = scalar_lea.vmem %s1252_s24, 32 }
 0x1dc   :  { %1482 = vmatpush3.msra.mxu1 %v795_v47  ;;  %v991_v47 = vadd.s32 8, %v989_v43  ;;  %vm990_vm6 = vcmp.ge.s32.totalorder %v2166_v46, %v989_v43  ;;  %v1077_v43 = vmul.f32 1.442695, %v1076_v42  ;;  %vm1215_vm0 = vcmp.eq.s32.totalorder %v1778_v41, %v2166_v46  ;;  %p1571_p0 = scmp.ne.s32.totalorder %s1252_s24, %s1570_s25  ;;  %p1575_p1 = scmp.lt.s32.totalorder %s1252_s24, %s1252_s24 }
 0x1dd   :  { %1483 = vmatprep.subr.mxu1 %v1593_v20  ;;  %p1576_p2 = scmp.lt.s32.totalorder %s1574_s7, %s1570_s25 }
 0x1de   :  { %1484 = vmatpush3.msra.mxu1 %v794_v48  ;;  %vm992_vm7 = vcmp.lt.s32.totalorder %v2166_v46, %v991_v47 }
 0x1df   :  { %1485 = vmatprep.subr.mxu1 %v1593_v20  ;;  %vm993_vm8 = vmand %vm990_vm6, %vm992_vm7  ;;  %p1577_p3 = por %p1576_p2, %p1575_p1 }
 0x1e0   :  { %1486 = vmatpush3.msra.mxu1 %v793_v49 }
 0x1e1   :  { %1525 = vmatprep.subr.mxu1 %v1593_v20  ;;  %p1578_p4 = pnand %p1577_p3, %p1571_p0 }
 0x28d   :  { %v1463_v52 = vpop.f32.mrf.mxu1 }
 0x28e   :  { %v2082_v53 = vadd.f32 %v1463_v52, %v590_v51 }
 0x28f   :  { %v664_v55 = vpop.f32.mrf.mxu1 }
 0x290   :  { %v2085_v56 = vadd.f32 %v664_v55, %v590_v51  ;;  %v676_v57 = vsel %vm591_vm3, %v2082_v53, 0.0 }
 0x291   :  { %677 = vadd.xlane.f32.xlu0 %v676_v57  ;;  %v788_v58 = vpop.f32.mrf.mxu1 }
 0x292   :  { %v789_v61 = vadd.f32 %v788_v58, %v716_v54  ;;  %v673_v0 = vsel %vm591_vm3, %v2085_v56, 0.0 }
 0x293   :  { %v1470_v62 = vpop.f32.mrf.mxu1 }
 0x294   :  { %v792_v63 = vmax.f32 %v789_v61, 0.0 }
 0x295   :  { %674 = vadd.xlane.f32.xlu0 %v673_v0 }
 0x296   :  { %1488 = vmatmul.mubr.msk.f32.vlgmr.msra.gmra.mxu1 %vm803_vm5, %v792_v63 }
 0x297   :  { %1529 = vmatprep.mubr.msk.f32.mxu1 %vm1594_vm2, %v1593_v20 }
 0x31a   :  { %v678_v18 = vpop.xlane.xlu0 %677 }
 0x31b   :  { %v681_v19 = vmul.f32 0.03125, %v678_v18 }
 0x31d   :  { %v683_v21 = vsub.f32 %v2082_v53, %v681_v19 }
 0x31e   :  { %v675_v22 = vpop.xlane.xlu0 %674 }
 0x31f   :  { %v680_v23 = vmul.f32 0.03125, %v675_v22  ;;  %v685_v24 = vmul.f32 %v683_v21, %v683_v21 }
 0x321   :  { %v682_v25 = vsub.f32 %v2085_v56, %v680_v23  ;;  %v689_v26 = vsel %vm591_vm3, %v685_v24, 0.0  ;;  %v994_v56 = vsel %vm993_vm8, 0.125, %v1593_v20 }
 0x322   :  { %690 = vadd.xlane.f32.xlu1 %v689_v26 }
 0x323   :  { %v684_v27 = vmul.f32 %v682_v25, %v682_v25 }
 0x325   :  { %v686_v28 = vsel %vm591_vm3, %v684_v27, 0.0 }
 0x326   :  { %687 = vadd.xlane.f32.xlu1 %v686_v28 }
 0x356   :  { %v873_v31 = vpop.f32.mrf.mxu1 }
 0x357   :  { %v874_v32 = vadd.f32 %v873_v31, %v801_v29 }
 0x358   :  { %v1489_v33 = vpop.f32.mrf.mxu1 }
 0x359   :  { %v877_v34 = vmax.f32 %v874_v32, 0.0 }
 0x35b   :  { %1523 = vmatmul.mubr.f32.vlgmr.msra.gmra.mxu0 %v877_v34 }
 0x3ab   :  { %v691_v35 = vpop.xlane.xlu1 %690 }
 0x3ac   :  { %v693_v36 = vmul.f32 0.03125, %v691_v35 }
 0x3ae   :  { %v695_v37 = vadd.f32 1e-05, %v693_v36 }
 0x3af   :  { %v688_v38 = vpop.xlane.xlu1 %687 }
 0x3b0   :  { %1548 = vrsqrt.f32 %v695_v37  ;;  %v692_v39 = vmul.f32 0.03125, %v688_v38 }
 0x3b2   :  { %v694_v40 = vadd.f32 1e-05, %v692_v39 }
 0x3b4   :  { %1550 = vrsqrt.f32 %v694_v40 }
 0x3bd   :  { %v1549_v48 = vpop.eup %1548 }
 0x3be   :  { %v699_v49 = vmul.f32 %v1549_v48, %v683_v21 }
 0x3c0   :  { %v705_v51 = vmul.f32 %v703_v45, %v699_v49 }
 0x3c1   :  { %v1551_v52 = vpop.eup %1550 }
 0x3c2   :  { %v711_v53 = vadd.f32 %v709_v50, %v705_v51  ;;  %v698_v54 = vmul.f32 %v1551_v52, %v682_v25 }
 0x3c4   :  { %1526 = vmatpush3.msra.mxu1 %v711_v53  ;;  %v704_v55 = vmul.f32 %v703_v45, %v698_v54 }
 0x3c5   :  { %1527 = vmatprep.subr.mxu1 %v1593_v20 }
 0x3c6   :  { %v710_v30 = vadd.f32 %v709_v50, %v704_v55 }
 0x3c8   :  { %1528 = vmatpush3.msra.mxu1 %v710_v30 }
 0x3c9   :  { %1530 = vmatmul.mubr.msk.f32.vlgmr.msra.gmra.mxu1 %vm718_vm4, %v994_v56  ;;  %1532 = vmatprep.subr.mxu1 %v1593_v20 }
 0x3ca   :  { %1534 = vmatprep.mubr.msk.f32.mxu1 %vm1594_vm2, %v1593_v20  ;;  %v1081_v20 = vsel %vm1080_vm10, %v1079_v4, 0.0  ;;  %vm1227_vm2 = vcmask 15360  }
 0x41b   :  { %v960_v57 = vpop.f32.mrf.mxu0 }
 0x41c   :  { %v961_v58 = vadd.f32 %v960_v57, %v44_v60 }
 0x41d   :  { %v1524_v61 = vpop.f32.mrf.mxu0 }
 0x41e   :  { %v965_v62 = vsel %vm964_vm9, %v961_v58, 0.0 }
 0x41f   :  { %966 = vadd.xlane.f32.xlu0 %v965_v62 }
 0x489   :  { %v1068_v5 = vpop.f32.mrf.mxu1 }
 0x48b   :  { %v1531_v6 = vpop.f32.mrf.mxu1 }
 0x4a8   :  { %v967_v63 = vpop.xlane.xlu0 %966 }
 0x4a9   :  { %v968_v0 = vmul.f32 0.03125, %v967_v63 }
 0x4ab   :  { %v969_v1 = vsub.f32 %v961_v58, %v968_v0 }
 0x4ad   :  { %v970_v2 = vmul.f32 %v969_v1, %v969_v1 }
 0x4af   :  { %v971_v3 = vsel %vm964_vm9, %v970_v2, 0.0 }
 0x4b0   :  { %972 = vadd.xlane.f32.xlu1 %v971_v3 }
 0x4b4   :  { %1082 = vadd.xlane.f32.xlu1 %v1081_v20 }
 0x539   :  { %v973_v7 = vpop.xlane.xlu1 %972 }
 0x53a   :  { %v974_v8 = vmul.f32 0.03125, %v973_v7 }
 0x53c   :  { %v975_v9 = vadd.f32 1e-05, %v974_v8 }
 0x53d   :  { %v1083_v23 = vpop.xlane.xlu1 %1082 }
 0x53e   :  { %1552 = vrsqrt.f32 %v975_v9  ;;  %vm1086_vm11 = vcmp.eq.f32.partialorder %v1083_v23, inf  ;;  %v1089_v28 = vand.u32 2147483648, %v1083_v23  ;;  %vm1088_vm12 = vcmp.eq.f32.partialorder %v1083_v23, 0.0 }
 0x53f   :  { %1554 = vrsqrt.f32 %v1083_v23 }
 0x54b   :  { %v1553_v11 = vpop.eup %1552 }
 0x54c   :  { %v977_v13 = vmul.f32 %v1553_v11, %v969_v1  ;;  %v1555_v25 = vpop.eup %1554 }
 0x54d   :  { %v1085_v26 = vmul.f32 %v1555_v25, %v1083_v23 }
 0x54e   :  { %v981_v14 = vmul.f32 %v979_v10, %v977_v13 }
 0x54f   :  { %v1087_v27 = vsel %vm1086_vm11, %v1083_v23, %v1085_v26 }
 0x550   :  { %v984_v16 = vadd.f32 %v982_v12, %v981_v14  ;;  %v1090_v31 = vsel %vm1088_vm12, %v1089_v28, %v1087_v27 }
 0x551   :  { %v1091_v34 = vmax.f32 %v1090_v31, 1e-12 }
 0x552   :  { %v998_v17 = vrot.slane %v984_v16, %v145_v59 }
 0x554   :  { %v1069_v18 = vadd.f32 %v1068_v5, %v998_v17 }
 0x556   :  { %v1072_v19 = vmul.f32 0.5, %v1069_v18 }
 0x558   :  { %v1094_v21 = vmul.f32 %v1072_v19, %v1072_v19 }
 0x55a   :  { %v1095_v22 = vsel %vm1080_vm10, %v1094_v21, 0.0 }
 0x55b   :  { %1096 = vadd.xlane.f32.xlu0 %v1095_v22 }
 0x5e4   :  { %v1097_v24 = vpop.xlane.xlu0 %1096 }
 0x5e5   :  { %1556 = vrsqrt.f32 %v1097_v24  ;;  %vm1100_vm13 = vcmp.eq.f32.partialorder %v1097_v24, inf  ;;  %v1103_v59 = vand.u32 2147483648, %v1097_v24  ;;  %vm1102_vm14 = vcmp.eq.f32.partialorder %v1097_v24, 0.0 }
 0x5f2   :  { %v1557_v29 = vpop.eup %1556 }
 0x5f3   :  { %v1099_v32 = vmul.f32 %v1557_v29, %v1097_v24 }
 0x5f5   :  { %v1101_v33 = vsel %vm1100_vm13, %v1097_v24, %v1099_v32 }
 0x5f6   :  { %v1104_v35 = vsel %vm1102_vm14, %v1103_v59, %v1101_v33 }
 0x5f7   :  { %v1105_v36 = vmax.f32 %v1104_v35, 1e-12 }
 0x5f9   :  { %1558 = vrcp.f32 %v1105_v36 }
 0x5fa   :  { %1560 = vrcp.f32 %v1091_v34 }
 0x5fb   :  { %1562 = vpow2.f32 %v1077_v43 }
 0x606   :  { %v1559_v37 = vpop.eup %1558 }
 0x607   :  { %v1561_v38 = vpop.eup %1560  ;;  %v1107_v39 = vmul.f32 %v1559_v37, %v1072_v19 }
 0x608   :  { %v1093_v40 = vmul.f32 %v1561_v38, %v2010_v15  ;;  %v1563_v44 = vpop.eup %1562 }
 0x609   :  { %1533 = vmatpush3.xpose.msk.msra.mxu1 %vm591_vm3, %v1107_v39 }
 0x60c   :  { %1535 = vmatmul.mubr.msk.f32.vlgmr.msra.gmra.mxu1 %vm591_vm3, %v1093_v40  ;;  %vm1243_vm3 = vcmask 0  }
 0x6cc   :  { %v1180_v45 = vpop.f32.mrf.mxu1 }
 0x6cd   :  { %v1184_v47 = vmul.f32 %v1563_v44, %v1180_v45 }
 0x6ce   :  { %v1536_v15 = vpop.f32.mrf.mxu1 }
 0x6cf   :  { %v1186_v48 = vsel %vm1185_vm15, %v1184_v47, -inf  ;;  %v1216_v49 = vsel %vm1215_vm0, %v1184_v47, 0.0 }
 0x6d0   :  { %1187 = vmax.xlane.f32.xlu0 %v1186_v48  ;;  %v1217_v50 = vsel %vm1185_vm15, %v1216_v49, 0.0 }
 0x6d4   :  { %1218 = vadd.xlane.f32.xlu0 %v1217_v50 }
 0x759   :  { %v1188_v51 = vpop.xlane.xlu0 %1187 }
 0x75a   :  { %v1190_v52 = vsel %vm1189_vm1, %v1188_v51, -inf }
 0x75b   :  { %v1191_v53 = vrot.slane %v1190_v52, 4 }
 0x75d   :  { %v1192_v54 = vmax.f32 %v1190_v52, %v1191_v53  ;;  %v1219_v7 = vpop.xlane.xlu0 %1218 }
 0x75e   :  { %v1231_v8 = vsel %vm1189_vm1, %v1219_v7, 0.0 }
 0x75f   :  { %v1193_v55 = vrot.slane %v1192_v54, 2  ;;  %v1232_v9 = vrot.slane %v1231_v8, 4 }
 0x761   :  { %v1194_v30 = vmax.f32 %v1192_v54, %v1193_v55  ;;  %v1233_v10 = vadd.f32 %v1232_v9, %v1231_v8 }
 0x763   :  { %v1195_v56 = vrot.slane %v1194_v30, 1  ;;  %v1234_v13 = vrot.slane %v1233_v10, 2 }
 0x765   :  { %v1196_v60 = vmax.f32 %v1194_v30, %v1195_v56  ;;  %v1235_v17 = vadd.f32 %v1234_v13, %v1233_v10 }
 0x767   :  { %v1197_v57 = vsub.f32 %v1184_v47, %v1196_v60  ;;  %v1236_v21 = vrot.slane %v1235_v17, 1 }
 0x769   :  { %v1198_v41 = vmul.f32 1.442695, %v1197_v57  ;;  %v1237_v25 = vadd.f32 %v1236_v21, %v1235_v17 }
 0x76b   :  { %1564 = vpow2.f32 %v1198_v41  ;;  %v1239_v29 = vmul.f32 2.0, %v1237_v25 }
 0x778   :  { %v1565_v46 = vpop.eup %1564 }
 0x779   :  { %v1200_v58 = vsel %vm1185_vm15, %v1565_v46, 0.0 }
 0x77a   :  { %1201 = vadd.xlane.f32.xlu1 %v1200_v58  ;;  %v1206_v61 = vrot.slane %v1200_v58, 4 }
 0x77c   :  { %v1207_v62 = vadd.f32 %v1206_v61, %v1200_v58 }
 0x77e   :  { %v1208_v63 = vrot.slane %v1207_v62, 2 }
 0x780   :  { %v1209_v0 = vadd.f32 %v1208_v63, %v1207_v62 }
 0x782   :  { %v1210_v1 = vrot.slane %v1209_v0, 1 }
 0x784   :  { %v1211_v2 = vadd.f32 %v1210_v1, %v1209_v0 }
 0x786   :  { %1566 = vlog2.f32 %v1211_v2 }
 0x793   :  { %v1567_v3 = vpop.eup %1566 }
 0x794   :  { %v1213_v4 = vmul.f32 0.6931472, %v1567_v3 }
 0x796   :  { %v1214_v20 = vadd.f32 %v1213_v4, %v1196_v60 }
 0x798   :  { %v1228_v5 = vsel %vm1227_vm2, %v1214_v20, 0.0 }
 0x799   :  { %1229 = vadd.xlane.f32.xlu1 %v1228_v5 }
 0x803   :  { %v1202_v6 = vpop.xlane.xlu1 %1201 }
 0x804   :  { %1568 = vlog2.f32 %v1202_v6 }
 0x811   :  { %v1569_v11 = vpop.eup %1568 }
 0x812   :  { %v1204_v12 = vmul.f32 0.6931472, %v1569_v11 }
 0x814   :  { %v1205_v14 = vadd.f32 %v1204_v12, %v1196_v60 }
 0x816   :  { %v1220_v16 = vsel %vm1189_vm1, %v1205_v14, 0.0 }
 0x817   :  { %v1221_v18 = vrot.slane %v1220_v16, 4 }
 0x819   :  { %v1222_v19 = vadd.f32 %v1221_v18, %v1220_v16 }
 0x81b   :  { %v1223_v22 = vrot.slane %v1222_v19, 2 }
 0x81d   :  { %v1224_v23 = vadd.f32 %v1223_v22, %v1222_v19 }
 0x81f   :  { %v1225_v24 = vrot.slane %v1224_v23, 1 }
 0x821   :  { %v1226_v26 = vadd.f32 %v1225_v24, %v1224_v23 }
 0x822   :  { %v1230_v27 = vpop.xlane.xlu1 %1229 }
 0x823   :  { %v1238_v28 = vadd.f32 %v1230_v27, %v1226_v26 }
 0x825   :  { %v1240_v31 = vsub.f32 %v1238_v28, %v1239_v29 }
 0x827   :  { %v1242_v32 = vmul.f32 0.25, %v1240_v31 }
 0x829   :  { %1244 = vst.msk [vmem:[#allocation3] sm:$0x1] %vm1243_vm3, %v1242_v32 }
 0x82a   :  { %1581 = shalt.err (!%p1578_p4)
}
 0x82b   :  { %1254 = dma.vmem_to_hbm [thread:$0]  %s1252_s24, 16, %s2215_s12, [#allocation4]  }
 0x82c   :  { %1590 = dma.done.wait [#allocation4], 16  }
 0x82d   :  { %1591 = vsyncadd [#allocation4], 4294967280 }
 0x82e   :  { %1258 = vsyncpa [#allocation4], 1 }

</bundles_post_ra>
